<compile_context>
chip_gen: v7x
topology: tpu7x:2x2x1
jax: 0.10.0
libtpu: 0.0.40
codegen_flags: <defaults>
</compile_context>

<pallas_src>
import jax
import jax.numpy as jnp
from jax.experimental import pallas as pl
from jax.experimental.pallas import tpu as pltpu

LATENT_DIM = 100
HIDDEN = 256
IMAGE_SIZE = 784


def _round_up(x, m):
    return (x + m - 1) // m * m


def _cdiv(a, b):
    return -(-a // b)


def _choose_batch_tile(B, max_tb=512):
    """Batch tile: multiple of 16, minimal padded rows, prefer an even number of
    tiles >= 2 (v7x 2-TC occupancy), then fewer/larger tiles (step overhead)."""
    B16 = _round_up(B, 16)
    if B16 <= 16:
        return B16
    best_score, best_tb = None, None
    for n_tiles in range(1, B16 // 16 + 1):
        tb = _round_up(_cdiv(B16, n_tiles), 16)
        if tb > max_tb:
            continue
        b_pad = _round_up(B16, tb)
        waste = b_pad - B16
        n_actual = b_pad // tb
        score = (waste, 0 if n_actual >= 2 else 1, n_actual % 2, n_actual)
        if best_score is None or score < best_score:
            best_score, best_tb = score, tb
    return best_tb if best_tb is not None else min(max_tb, B16)


def _generator_kernel(z_ref, w1_ref, b1_ref, w2_ref, b2_ref, o_ref):
    # In-kernel bf16 cast of z (cheap VPU op, hidden under the input DMA).
    z = z_ref[...].astype(jnp.bfloat16)
    # Linear 1: [TB, 100](bf16) @ [100, 256](bf16) -> f32 accumulation on the MXU.
    h = jnp.dot(z, w1_ref[...], preferred_element_type=jnp.float32)
    h = h + b1_ref[...]
    # LeakyReLU(0.2) in f32 (VPU).
    h = jnp.where(h > 0, h, 0.2 * h)
    # Linear 2: [TB, 256](bf16) @ [256, 784](bf16) -> f32 accumulation.
    y = jnp.dot(h.astype(jnp.bfloat16), w2_ref[...],
                preferred_element_type=jnp.float32)
    y = y + b2_ref[...]
    # Tanh in f32 on the EUP (v5e has no bf16 EUP), cast only on the store.
    o_ref[...] = jnp.tanh(y).astype(o_ref.dtype)


def prepare_params(w1, b1, w2, b2):
    """One-time parameter prep (do this once, not per forward call):
    bf16 weights for the MXU, 2-D f32 biases for lane-broadcast adds."""
    return (
        w1.astype(jnp.bfloat16),                               # [100, 256]
        b1.reshape(1, HIDDEN).astype(jnp.float32),             # [1, 256]
        w2.astype(jnp.bfloat16),                               # [256, 784]
        b2.reshape(1, IMAGE_SIZE).astype(jnp.float32),         # [1, 784]
    )


def generator_forward(z, params, *, max_tb=512, out_dtype=jnp.bfloat16):
    """z: [B, latent_dim] f32.  params: output of prepare_params.
    Returns [B, image_size] in `out_dtype` (bf16 default; tanh output is in
    [-1, 1], so bf16 loses ~3 decimal digits and halves the HBM write)."""
    w1_bf, b1_2d, w2_bf, b2_2d = params
    B = z.shape[0]

    TB = _choose_batch_tile(B, max_tb=max_tb)
    B_pad = _round_up(B, TB)
    n_tiles = B_pad // TB

    # Only touch z in the wrapper if row padding is actually required.
    z_in = z if B_pad == B else jnp.pad(z, ((0, B_pad - B), (0, 0)))

    resident = lambda shape: pl.BlockSpec(shape, lambda i: (0, 0))

    out = pl.pallas_call(
        _generator_kernel,
        out_shape=jax.ShapeDtypeStruct((B_pad, IMAGE_SIZE), out_dtype),
        grid=(n_tiles,),
        in_specs=[
            pl.BlockSpec((TB, LATENT_DIM), lambda i: (i, 0)),   # z: batch-tiled
            resident((LATENT_DIM, HIDDEN)),                     # w1: VMEM-resident
            resident((1, HIDDEN)),                              # b1
            resident((HIDDEN, IMAGE_SIZE)),                     # w2
            resident((1, IMAGE_SIZE)),                          # b2
        ],
        out_specs=pl.BlockSpec((TB, IMAGE_SIZE), lambda i: (i, 0)),
        compiler_params=pltpu.CompilerParams(
            dimension_semantics=("parallel",),
        ),
    )(z_in, w1_bf, b1_2d, w2_bf, b2_2d)

    return out if B_pad == B else out[:B]


def init_params(key):
    """Deterministic init matching PyTorch Linear default (U(-1/sqrt(fan_in), +1/sqrt(fan_in)))."""
    k1, k2, k3, k4 = jax.random.split(key, 4)
    bound1 = 1.0 / jnp.sqrt(LATENT_DIM)
    bound2 = 1.0 / jnp.sqrt(HIDDEN)
    # Stored as [in_features, out_features] (transposed vs. PyTorch's [out, in]).
    w1 = jax.random.uniform(k1, (LATENT_DIM, HIDDEN), jnp.float32, -bound1, bound1)
    b1 = jax.random.uniform(k2, (HIDDEN,), jnp.float32, -bound1, bound1)
    w2 = jax.random.uniform(k3, (HIDDEN, IMAGE_SIZE), jnp.float32, -bound2, bound2)
    b2 = jax.random.uniform(k4, (IMAGE_SIZE,), jnp.float32, -bound2, bound2)
    return w1, b1, w2, b2


def reference_forward(z, w1, b1, w2, b2):
    h = z @ w1 + b1
    h = jnp.where(h > 0, h, 0.2 * h)
    return jnp.tanh(h @ w2 + b2)


if __name__ == "__main__":
    key = jax.random.PRNGKey(0)
    kz, kp = jax.random.split(key)
    w1, b1, w2, b2 = init_params(kp)
    params = prepare_params(w1, b1, w2, b2)   # one-time prep, reused below

    # Small batch: single tile, row padding + row slice, default bf16 output.
    batch = 4
    z = jax.random.normal(kz, (batch, LATENT_DIM), jnp.float32)
    out = jax.block_until_ready(generator_forward(z, params))
    ref = reference_forward(z, w1, b1, w2, b2)
    assert out.shape == (batch, IMAGE_SIZE), out.shape
    assert out.dtype == jnp.bfloat16, out.dtype
    # bf16 matmul inputs + bf16 output quantization -> relaxed tolerance.
    err = jnp.max(jnp.abs(out.astype(jnp.float32) - ref))
    assert jnp.allclose(out.astype(jnp.float32), ref, atol=3e-2, rtol=3e-2), float(err)

    # Multi-tile batch that divides the chosen tile exactly (no padding, no
    # slicing, no wrapper ops on z); f32 output path.
    batch2 = 384
    z2 = jax.random.normal(kz, (batch2, LATENT_DIM), jnp.float32)
    out2 = jax.block_until_ready(
        generator_forward(z2, params, out_dtype=jnp.float32))
    ref2 = reference_forward(z2, w1, b1, w2, b2)
    assert out2.shape == (batch2, IMAGE_SIZE), out2.shape
    err2 = jnp.max(jnp.abs(out2 - ref2))
    assert jnp.allclose(out2, ref2, atol=2e-2, rtol=2e-2), float(err2)

    print("KERNEL_OK")
</pallas_src>

<mosaic_0001>
module attributes {stable_mosaic.version = 11 : i64} {
  func.func @_generator_kernel(%arg0: i32, %arg1: memref<16x100xf32, #tpu.memory_space<vmem>>, %arg2: memref<100x256xbf16, #tpu.memory_space<vmem>>, %arg3: memref<1x256xf32, #tpu.memory_space<vmem>>, %arg4: memref<256x784xbf16, #tpu.memory_space<vmem>>, %arg5: memref<1x784xf32, #tpu.memory_space<vmem>>, %arg6: memref<16x784xbf16, #tpu.memory_space<vmem>>) attributes {dimension_semantics = [#tpu.dimension_semantics<parallel>], iteration_bounds = array<i64: 1>, scalar_prefetch = 0 : i64, scratch_operands = 0 : i64, tpu.core_type = #tpu.core_type<tc>, window_params = [{transform_indices = @transform_0, window_bounds = array<i64: 16, 100>}, {pipeline_mode = #tpu.pipeline_mode<synchronous>, transform_indices = @transform_1, window_bounds = array<i64: 100, 256>}, {pipeline_mode = #tpu.pipeline_mode<synchronous>, transform_indices = @transform_2, window_bounds = array<i64: 1, 256>}, {pipeline_mode = #tpu.pipeline_mode<synchronous>, transform_indices = @transform_3, window_bounds = array<i64: 256, 784>}, {pipeline_mode = #tpu.pipeline_mode<synchronous>, transform_indices = @transform_4, window_bounds = array<i64: 1, 784>}, {transform_indices = @transform_5, window_bounds = array<i64: 16, 784>}]} {
    %c0 = arith.constant 0 : index
    %c0_0 = arith.constant 0 : index
    %0 = vector.load %arg1[%c0, %c0_0] : memref<16x100xf32, #tpu.memory_space<vmem>>, vector<16x100xf32>
    %1 = arith.truncf %0 : vector<16x100xf32> to vector<16x100xbf16>
    %c0_1 = arith.constant 0 : index
    %c0_2 = arith.constant 0 : index
    %2 = vector.load %arg2[%c0_1, %c0_2] : memref<100x256xbf16, #tpu.memory_space<vmem>>, vector<100x256xbf16>
    %cst = arith.constant dense<0.000000e+00> : vector<16x256xf32>
    %3 = tpu.matmul %1, %2, %cst {dimension_numbers = #tpu.dot_dimension_numbers<[1], [0], [0], [1], [0, 0, 1, 1], [], []>} : vector<16x100xbf16>, vector<100x256xbf16>, vector<16x256xf32> -> vector<16x256xf32>
    %c0_3 = arith.constant 0 : index
    %c0_4 = arith.constant 0 : index
    %4 = vector.load %arg3[%c0_3, %c0_4] : memref<1x256xf32, #tpu.memory_space<vmem>>, vector<1x256xf32>
    %5 = vector.broadcast %4 : vector<1x256xf32> to vector<16x256xf32>
    %6 = arith.addf %3, %5 : vector<16x256xf32>
    %cst_5 = arith.constant 0.000000e+00 : f32
    %7 = vector.broadcast %cst_5 : f32 to vector<16x256xf32>
    %8 = arith.cmpf ogt, %6, %7 : vector<16x256xf32>
    %cst_6 = arith.constant 2.000000e-01 : f32
    %9 = vector.broadcast %cst_6 : f32 to vector<16x256xf32>
    %10 = arith.mulf %9, %6 : vector<16x256xf32>
    %11 = arith.select %8, %6, %10 : vector<16x256xi1>, vector<16x256xf32>
    %12 = arith.truncf %11 : vector<16x256xf32> to vector<16x256xbf16>
    %c0_7 = arith.constant 0 : index
    %c0_8 = arith.constant 0 : index
    %13 = vector.load %arg4[%c0_7, %c0_8] : memref<256x784xbf16, #tpu.memory_space<vmem>>, vector<256x784xbf16>
    %cst_9 = arith.constant dense<0.000000e+00> : vector<16x784xf32>
    %14 = tpu.matmul %12, %13, %cst_9 {dimension_numbers = #tpu.dot_dimension_numbers<[1], [0], [0], [1], [0, 0, 1, 1], [], []>} : vector<16x256xbf16>, vector<256x784xbf16>, vector<16x784xf32> -> vector<16x784xf32>
    %c0_10 = arith.constant 0 : index
    %c0_11 = arith.constant 0 : index
    %15 = vector.load %arg5[%c0_10, %c0_11] : memref<1x784xf32, #tpu.memory_space<vmem>>, vector<1x784xf32>
    %16 = vector.broadcast %15 : vector<1x784xf32> to vector<16x784xf32>
    %17 = arith.addf %14, %16 : vector<16x784xf32>
    %18 = math.tanh %17 : vector<16x784xf32>
    %19 = arith.truncf %18 : vector<16x784xf32> to vector<16x784xbf16>
    %c0_12 = arith.constant 0 : index
    %c0_13 = arith.constant 0 : index
    %20 = vector.load %arg6[%c0_12, %c0_13] : memref<16x784xbf16, #tpu.memory_space<vmem>>, vector<16x784xbf16>
    tpu.vector_store %arg6[%c0_12, %c0_13], %19 {strides = array<i32>} : memref<16x784xbf16, #tpu.memory_space<vmem>>, vector<16x784xbf16>,
    return
  }
  func.func @transform_0(%arg0: i32) -> (i32, i32) {
    %c0_i32 = arith.constant 0 : i32
    %c0_i32_0 = arith.constant 0 : i32
    return %arg0, %c0_i32 : i32, i32
  }
  func.func @transform_1(%arg0: i32) -> (i32, i32) {
    %c0_i32 = arith.constant 0 : i32
    %c0_i32_0 = arith.constant 0 : i32
    %c0_i32_1 = arith.constant 0 : i32
    return %c0_i32, %c0_i32_0 : i32, i32
  }
  func.func @transform_2(%arg0: i32) -> (i32, i32) {
    %c0_i32 = arith.constant 0 : i32
    %c0_i32_0 = arith.constant 0 : i32
    %c0_i32_1 = arith.constant 0 : i32
    return %c0_i32, %c0_i32_0 : i32, i32
  }
  func.func @transform_3(%arg0: i32) -> (i32, i32) {
    %c0_i32 = arith.constant 0 : i32
    %c0_i32_0 = arith.constant 0 : i32
    %c0_i32_1 = arith.constant 0 : i32
    return %c0_i32, %c0_i32_0 : i32, i32
  }
  func.func @transform_4(%arg0: i32) -> (i32, i32) {
    %c0_i32 = arith.constant 0 : i32
    %c0_i32_0 = arith.constant 0 : i32
    %c0_i32_1 = arith.constant 0 : i32
    return %c0_i32, %c0_i32_0 : i32, i32
  }
  func.func @transform_5(%arg0: i32) -> (i32, i32) {
    %c0_i32 = arith.constant 0 : i32
    %c0_i32_0 = arith.constant 0 : i32
    return %arg0, %c0_i32 : i32, i32
  }
}

</mosaic_0001>

<bundles_post_ra>
// kernel: tpu_custom_call.1
= control target key start
LH: loop header
LB: loop body
LE: loop exit
PB: predicated region body
PF: predicated region fallthrough
CT: control target
= control target key end

     0   :  { %v1579_v2 = vmov 0   ;;  %vm119_vm0 = vcmask 1041408   ;;  %vm115_vm1 = vcmask 818176   ;;  %s2044_s0 = inlined_call_operand.vmem [shape: f32[16,100], index: 0, kind: input, shape index: {}]   ;;  %s2045_s1 = inlined_call_operand.vmem [shape: bf16[100,256], index: 1, kind: input, shape index: {}]   ;;  %s2046_s2 = inlined_call_operand.vmem [shape: f32[1,256], index: 2, kind: input, shape index: {}]   ;;  %s2047_s3 = inlined_call_operand.vmem [shape: bf16[256,784], index: 3, kind: input, shape index: {}]   ;;  %s2048_s4 = inlined_call_operand.vmem [shape: f32[1,784], index: 4, kind: input, shape index: {}]   ;;  %s2049_s5 = inlined_call_operand.hbm [shape: bf16[16,784], index: 5, kind: output, shape index: {}]  }
   0x1   :  { %v1347_v0 = vld [vmem:[%s2045_s1 + $0x4] ss:$8 sps:$4 sm:$0xff]   ;;  %v1349_v1 = vld [vmem:[%s2045_s1] ss:$8 sps:$4 sm:$0xff]   ;;  %158 = vmatprep.mubr.bf16.mxu0 %v1579_v2  ;;  %v1350_v3 = vld [vmem:[%s2045_s1 + $0x14] ss:$8 sps:$4 sm:$0xff]  }
   0x2   :  { %126 = vmatprep.subr.bf16.mxu0 %v1347_v0  ;;  %v1352_v4 = vld [vmem:[%s2045_s1 + $0x10] ss:$8 sps:$4 sm:$0xff]   ;;  %v1353_v5 = vld [vmem:[%s2045_s1 + $0x24] ss:$8 sps:$4 sm:$0xff]   ;;  %v1355_v6 = vld [vmem:[%s2045_s1 + $0x20] ss:$8 sps:$4 sm:$0xff]  }
   0x3   :  { %127 = vmatpush1.bf16.msra.mxu0 %v1349_v1  ;;  %v1356_v7 = vld [vmem:[%s2045_s1 + $0x34] ss:$8 sps:$4 sm:$0xff]   ;;  %v1367_v8 = vld [vmem:[%s2047_s3 + $0x4] ss:$28 sps:$4 sm:$0xff]   ;;  %v1358_v9 = vld [vmem:[%s2045_s1 + $0x30] ss:$8 sps:$4 sm:$0xff]  }
   0x4   :  { %128 = vmatprep.subr.bf16.mxu0 %v1350_v3  ;;  %v1359_v10 = vld [vmem:[%s2045_s1 + $0x44] ss:$8 sps:$4 sm:$0xff]   ;;  %924 = vmatprep.subr.bf16.mxu1 %v1367_v8  ;;  %v1372_v11 = vld [vmem:[%s2047_s3] ss:$28 sps:$4 sm:$0xff]   ;;  %v1378_v14 = vld [vmem:[%s2047_s3 + $0x38] ss:$28 sps:$4 sm:$0xff]  }
   0x5   :  { %v1373_v12 = vld [vmem:[%s2047_s3 + $0x3c] ss:$28 sps:$4 sm:$0xff]   ;;  %v1361_v13 = vld [vmem:[%s2045_s1 + $0x40] ss:$8 sps:$4 sm:$0xff]   ;;  %925 = vmatpush1.bf16.msra.mxu1 %v1372_v11  ;;  %v1379_v15 = vld [vmem:[%s2047_s3 + $0x74] ss:$28 sps:$4 sm:$0xff]  }
   0x6   :  { %926 = vmatprep.subr.bf16.mxu1 %v1373_v12  ;;  %v1362_v16 = vld [vmem:[%s2045_s1 + $0x54] ss:$8 sps:$4 sm:$0xff]   ;;  %v37_v17 = vld [vmem:[%s2045_s1 + $0x60] sm:$0x33]  ;;  %v1384_v18 = vld [vmem:[%s2047_s3 + $0x70] ss:$28 sps:$4 sm:$0xff]  }
   0x7   :  { %129 = vmatpush1.bf16.msra.mxu0 %v1352_v4  ;;  %v1385_v19 = vld [vmem:[%s2047_s3 + $0xac] ss:$28 sps:$4 sm:$0xff]   ;;  %v1364_v20 = vld [vmem:[%s2045_s1 + $0x50] ss:$8 sps:$4 sm:$0xff]   ;;  %v1190_v21 = vcombine.high %v37_v17, %v37_v17  ;;  %v1189_v22 = vcombine.low %v37_v17, %v37_v17  ;;  %v22_v23 = vld [vmem:[%s2044_s0] sm:$0xff] }
   0x8   :  { %130 = vmatprep.subr.bf16.mxu0 %v1353_v5  ;;  %v1390_v24 = vld [vmem:[%s2047_s3 + $0xa8] ss:$28 sps:$4 sm:$0xff]   ;;  %v1396_v29 = vld [vmem:[%s2047_s3 + $0xe0] ss:$28 sps:$4 sm:$0xff]   ;;  %v1402_v34 = vld [vmem:[%s2047_s3 + $0x118] ss:$28 sps:$4 sm:$0xff]  }
   0x9   :  { %927 = vmatpush1.bf16.msra.mxu1 %v1378_v14  ;;  %v1391_v25 = vld [vmem:[%s2047_s3 + $0xe4] ss:$28 sps:$4 sm:$0xff]   ;;  %v23_v26 = vld [vmem:[%s2044_s0 + $0x8] sm:$0xff]  ;;  %v121_v27 = vsel %vm119_vm0, %v1189_v22, 0  ;;  %v1397_v31 = vld [vmem:[%s2047_s3 + $0x11c] ss:$28 sps:$4 sm:$0xff]  }
   0xa   :  { %928 = vmatprep.subr.bf16.mxu1 %v1379_v15  ;;  %v1371_v28 = vld [vmem:[%s2047_s3 + $0xc] ss:$28 sps:$4 sm:$0xff]   ;;  %v24_v30 = vpack.c.bf16 %v23_v26, %v22_v23  ;;  %v1377_v33 = vld [vmem:[%s2047_s3 + $0x44] ss:$28 sps:$4 sm:$0xff]   ;;  %v1403_v35 = vld [vmem:[%s2047_s3 + $0x154] ss:$28 sps:$4 sm:$0xff]  }
   0xb   :  { %131 = vmatpush1.bf16.msra.mxu0 %v1355_v6  ;;  %v1369_v32 = vld [vmem:[%s2047_s3 + $0x8] ss:$28 sps:$4 sm:$0xff]   ;;  %v1375_v36 = vld [vmem:[%s2047_s3 + $0x40] ss:$28 sps:$4 sm:$0xff]   ;;  %v1408_v38 = vld [vmem:[%s2047_s3 + $0x150] ss:$28 sps:$4 sm:$0xff]  }
   0xc   :  { %132 = vmatprep.subr.bf16.mxu0 %v1356_v7  ;;  %v1383_v37 = vld [vmem:[%s2047_s3 + $0x7c] ss:$28 sps:$4 sm:$0xff]   ;;  %v1409_v39 = vld [vmem:[%s2047_s3 + $0x18c] ss:$28 sps:$4 sm:$0xff]   ;;  %v1389_v41 = vld [vmem:[%s2047_s3 + $0xb4] ss:$28 sps:$4 sm:$0xff]  }
   0xd   :  { %929 = vmatpush1.bf16.msra.mxu1 %v1384_v18  ;;  %v1381_v40 = vld [vmem:[%s2047_s3 + $0x78] ss:$28 sps:$4 sm:$0xff]   ;;  %v1414_v42 = vld [vmem:[%s2047_s3 + $0x188] ss:$28 sps:$4 sm:$0xff]   ;;  %v1387_v44 = vld [vmem:[%s2047_s3 + $0xb0] ss:$28 sps:$4 sm:$0xff]  }
   0xe   :  { %930 = vmatprep.subr.bf16.mxu1 %v1385_v19  ;;  %v1415_v43 = vld [vmem:[%s2047_s3 + $0x1c4] ss:$28 sps:$4 sm:$0xff]   ;;  %v1395_v45 = vld [vmem:[%s2047_s3 + $0xec] ss:$28 sps:$4 sm:$0xff]   ;;  %v1421_v47 = vld [vmem:[%s2047_s3 + $0x1fc] ss:$28 sps:$4 sm:$0xff]  }
   0xf   :  { %133 = vmatpush1.bf16.msra.mxu0 %v1358_v9  ;;  %v1420_v46 = vld [vmem:[%s2047_s3 + $0x1c0] ss:$28 sps:$4 sm:$0xff]   ;;  %v1393_v48 = vld [vmem:[%s2047_s3 + $0xe8] ss:$28 sps:$4 sm:$0xff]   ;;  %v1426_v51 = vld [vmem:[%s2047_s3 + $0x1f8] ss:$28 sps:$4 sm:$0xff]  }
  0x10   :  { %134 = vmatprep.subr.bf16.mxu0 %v1359_v10  ;;  %v1401_v49 = vld [vmem:[%s2047_s3 + $0x124] ss:$28 sps:$4 sm:$0xff]   ;;  %v1407_v52 = vld [vmem:[%s2047_s3 + $0x15c] ss:$28 sps:$4 sm:$0xff]   ;;  %v1427_v53 = vld [vmem:[%s2047_s3 + $0x234] ss:$28 sps:$4 sm:$0xff]  }
  0x11   :  { %931 = vmatpush1.bf16.msra.mxu1 %v1390_v24  ;;  %v1399_v50 = vld [vmem:[%s2047_s3 + $0x120] ss:$28 sps:$4 sm:$0xff]   ;;  %v1432_v54 = vld [vmem:[%s2047_s3 + $0x230] ss:$28 sps:$4 sm:$0xff]   ;;  %v1405_v56 = vld [vmem:[%s2047_s3 + $0x158] ss:$28 sps:$4 sm:$0xff]  }
  0x12   :  { %932 = vmatprep.subr.bf16.mxu1 %v1391_v25  ;;  %v1433_v55 = vld [vmem:[%s2047_s3 + $0x26c] ss:$28 sps:$4 sm:$0xff]   ;;  %v1413_v57 = vld [vmem:[%s2047_s3 + $0x194] ss:$28 sps:$4 sm:$0xff]   ;;  %v1439_v59 = vld [vmem:[%s2047_s3 + $0x2a4] ss:$28 sps:$4 sm:$0xff]  }
  0x13   :  { %135 = vmatpush1.bf16.msra.mxu0 %v1361_v13  ;;  %v1438_v58 = vld [vmem:[%s2047_s3 + $0x268] ss:$28 sps:$4 sm:$0xff]   ;;  %v1411_v60 = vld [vmem:[%s2047_s3 + $0x190] ss:$28 sps:$4 sm:$0xff]   ;;  %v1444_v62 = vld [vmem:[%s2047_s3 + $0x2a0] ss:$28 sps:$4 sm:$0xff]  }
  0x14   :  { %136 = vmatprep.subr.bf16.mxu0 %v1362_v16  ;;  %v1419_v61 = vld [vmem:[%s2047_s3 + $0x1cc] ss:$28 sps:$4 sm:$0xff]   ;;  %v1445_v63 = vld [vmem:[%s2047_s3 + $0x2dc] ss:$28 sps:$4 sm:$0xff]   ;;  %v1425_v1 = vld [vmem:[%s2047_s3 + $0x204] ss:$28 sps:$4 sm:$0xff]  }
  0x15   :  { %933 = vmatpush1.bf16.msra.mxu1 %v1396_v29  ;;  %v1417_v0 = vld [vmem:[%s2047_s3 + $0x1c8] ss:$28 sps:$4 sm:$0xff]   ;;  %v1423_v2 = vld [vmem:[%s2047_s3 + $0x200] ss:$28 sps:$4 sm:$0xff]   ;;  %v1429_v4 = vld [vmem:[%s2047_s3 + $0x238] ss:$28 sps:$4 sm:$0xff]  }
  0x16   :  { %934 = vmatprep.subr.bf16.mxu1 %v1397_v31  ;;  %v1431_v3 = vld [vmem:[%s2047_s3 + $0x23c] ss:$28 sps:$4 sm:$0xff]   ;;  %v1437_v5 = vld [vmem:[%s2047_s3 + $0x274] ss:$28 sps:$4 sm:$0xff]  }
  0x17   :  { %137 = vmatpush1.bf16.msra.mxu0 %v1364_v20 }
  0x18   :  { %1191 = vmatprep.subr.msk.bf16.mxu0 %vm119_vm0, %v1190_v21 }
  0x19   :  { %935 = vmatpush1.bf16.msra.mxu1 %v1402_v34 }
  0x1a   :  { %936 = vmatprep.subr.bf16.mxu1 %v1403_v35 }
  0x1b   :  { %139 = vmatpush1.bf16.msra.mxu0 %v121_v27 }
  0x1c   :  { %967 = vmatprep.subr.bf16.mxu0 %v1371_v28 }
  0x1d   :  { %937 = vmatpush1.bf16.msra.mxu1 %v1408_v38 }
  0x1e   :  { %1192 = vmatmul.mubr.msk.bf16.vlgmr.msra.gmra.mrb[0].mxu0 %vm115_vm1, %v24_v30  ;;  %938 = vmatprep.subr.bf16.mxu1 %v1409_v39 }
  0x1f   :  { %968 = vmatpush1.bf16.msra.mxu0 %v1369_v32 }
  0x20   :  { %969 = vmatprep.subr.bf16.mxu0 %v1377_v33 }
  0x21   :  { %939 = vmatpush1.bf16.msra.mxu1 %v1414_v42 }
  0x22   :  { %940 = vmatprep.subr.bf16.mxu1 %v1415_v43 }
  0x23   :  { %970 = vmatpush1.bf16.msra.mxu0 %v1375_v36 }
  0x24   :  { %971 = vmatprep.subr.bf16.mxu0 %v1383_v37 }
  0x25   :  { %941 = vmatpush1.bf16.msra.mxu1 %v1420_v46 }
  0x26   :  { %942 = vmatprep.subr.bf16.mxu1 %v1421_v47 }
  0x27   :  { %972 = vmatpush1.bf16.msra.mxu0 %v1381_v40 }
  0x28   :  { %973 = vmatprep.subr.bf16.mxu0 %v1389_v41 }
  0x29   :  { %943 = vmatpush1.bf16.msra.mxu1 %v1426_v51 }
  0x2a   :  { %944 = vmatprep.subr.bf16.mxu1 %v1427_v53 }
  0x2b   :  { %974 = vmatpush1.bf16.msra.mxu0 %v1387_v44 }
  0x2c   :  { %975 = vmatprep.subr.bf16.mxu0 %v1395_v45 }
  0x2d   :  { %945 = vmatpush1.bf16.msra.mxu1 %v1432_v54 }
  0x2e   :  { %946 = vmatprep.subr.bf16.mxu1 %v1433_v55 }
  0x2f   :  { %976 = vmatpush1.bf16.msra.mxu0 %v1393_v48 }
  0x30   :  { %977 = vmatprep.subr.bf16.mxu0 %v1401_v49 }
  0x31   :  { %947 = vmatpush1.bf16.msra.mxu1 %v1438_v58 }
  0x32   :  { %948 = vmatprep.subr.bf16.mxu1 %v1439_v59 }
  0x33   :  { %978 = vmatpush1.bf16.msra.mxu0 %v1399_v50 }
  0x34   :  { %979 = vmatprep.subr.bf16.mxu0 %v1407_v52 }
  0x35   :  { %949 = vmatpush1.bf16.msra.mxu1 %v1444_v62 }
  0x36   :  { %950 = vmatprep.subr.bf16.mxu1 %v1445_v63 }
  0x37   :  { %980 = vmatpush1.bf16.msra.mxu0 %v1405_v56 }
  0x38   :  { %981 = vmatprep.subr.bf16.mxu0 %v1413_v57 }
  0x3b   :  { %982 = vmatpush1.bf16.msra.mxu0 %v1411_v60 }
  0x3c   :  { %983 = vmatprep.subr.bf16.mxu0 %v1419_v61 }
  0x3f   :  { %984 = vmatpush1.bf16.msra.mxu0 %v1417_v0 }
  0x40   :  { %985 = vmatprep.subr.bf16.mxu0 %v1425_v1 }
  0x43   :  { %986 = vmatpush1.bf16.msra.mxu0 %v1423_v2 }
  0x44   :  { %987 = vmatprep.subr.bf16.mxu0 %v1431_v3 }
  0x45   :  { %10 = vsyncpa [#allocation3], 0  ;;  %v1435_v6 = vld [vmem:[%s2047_s3 + $0x270] ss:$28 sps:$4 sm:$0xff]   ;;  %v1441_v8 = vld [vmem:[%s2047_s3 + $0x2a8] ss:$28 sps:$4 sm:$0xff]   ;;  %v40_v22 = vlaneseq }
  0x46   :  { %v1443_v7 = vld [vmem:[%s2047_s3 + $0x2ac] ss:$28 sps:$4 sm:$0xff]   ;;  %v1449_v9 = vld [vmem:[%s2047_s3 + $0x2e4] ss:$28 sps:$4 sm:$0xff]   ;;  %v1450_v11 = vld [vmem:[%s2047_s3 + $0x2d8] ss:$28 sps:$4 sm:$0xff]  }
  0x47   :  { %988 = vmatpush1.bf16.msra.mxu0 %v1429_v4  ;;  %v1447_v10 = vld [vmem:[%s2047_s3 + $0x2e0] ss:$28 sps:$4 sm:$0xff]   ;;  %951 = vmatpush1.bf16.msra.mxu1 %v1450_v11  ;;  %v1451_v12 = vld [vmem:[%s2047_s3 + $0x314] ss:$28 sps:$4 sm:$0xff]   ;;  %v1457_v16 = vld [vmem:[%s2047_s3 + $0x34c] ss:$28 sps:$4 sm:$0xff]  }
  0x48   :  { %989 = vmatprep.subr.bf16.mxu0 %v1437_v5  ;;  %v1455_v13 = vld [vmem:[%s2047_s3 + $0x31c] ss:$28 sps:$4 sm:$0xff]   ;;  %v1456_v15 = vld [vmem:[%s2047_s3 + $0x310] ss:$28 sps:$4 sm:$0xff]   ;;  %952 = vmatprep.subr.bf16.mxu1 %v1451_v12  ;;  %v1462_v19 = vld [vmem:[%s2047_s3 + $0x348] ss:$28 sps:$4 sm:$0xff]  }
  0x49   :  { %v1453_v14 = vld [vmem:[%s2047_s3 + $0x318] ss:$28 sps:$4 sm:$0xff]   ;;  %v1459_v18 = vld [vmem:[%s2047_s3 + $0x350] ss:$28 sps:$4 sm:$0xff]   ;;  %v1856_v23 = vshrl.u32 %v40_v22, 7  ;;  %vm1155_vm6 = vcmask 125952  }
  0x4a   :  { %v1461_v17 = vld [vmem:[%s2047_s3 + $0x354] ss:$28 sps:$4 sm:$0xff]   ;;  %v38_v25 = vld [vmem:[%s2046_s2] sm:$0x3]  ;;  %v1470_v49 = vld [vmem:[%s2047_s3 + $0x4c] ss:$28 sps:$4 sm:$0xff]  }
  0x4b   :  { %990 = vmatpush1.bf16.msra.mxu0 %v1435_v6  ;;  %953 = vmatpush1.bf16.msra.mxu1 %v1456_v15  ;;  %v1465_v20 = vld [vmem:[%s2047_s3 + $0x14] ss:$28 sps:$4 sm:$0xff]   ;;  %v42_v24 = vsub.s32 0, %v1856_v23  ;;  %v46_v26 = vsub.s32 1, %v1856_v23  ;;  %v1468_v51 = vld [vmem:[%s2047_s3 + $0x48] ss:$28 sps:$4 sm:$0xff]  }
  0x4c   :  { %991 = vmatprep.subr.bf16.mxu0 %v1443_v7  ;;  %954 = vmatprep.subr.bf16.mxu1 %v1457_v16  ;;  %v1466_v21 = vld [vmem:[%s2047_s3 + $0x1d8] ss:$28 sps:$4 sm:$0xff]   ;;  %v1463_v47 = vld [vmem:[%s2047_s3 + $0x10] ss:$28 sps:$4 sm:$0xff]   ;;  %v1475_v53 = vld [vmem:[%s2047_s3 + $0x84] ss:$28 sps:$4 sm:$0xff]  }
  0x4d   :  { %v43_v27 = vrot.slane %v38_v25, %v42_v24  ;;  %v47_v28 = vrot.slane %v38_v25, %v46_v26  ;;  %v1467_v48 = vld [vmem:[%s2047_s3 + $0x18] ss:$28 sps:$4 sm:$0xff]   ;;  %v1471_v50 = vld [vmem:[%s2047_s3 + $0x210] ss:$28 sps:$4 sm:$0xff]   ;;  %v1476_v54 = vld [vmem:[%s2047_s3 + $0x248] ss:$28 sps:$4 sm:$0xff]  }
  0x4e   :  { %v1472_v52 = vld [vmem:[%s2047_s3 + $0x50] ss:$28 sps:$4 sm:$0xff]   ;;  %v1473_v55 = vld [vmem:[%s2047_s3 + $0x80] ss:$28 sps:$4 sm:$0xff]   ;;  %v1477_v56 = vld [vmem:[%s2047_s3 + $0x88] ss:$28 sps:$4 sm:$0xff]  }
  0x4f   :  { %992 = vmatpush1.bf16.msra.mxu0 %v1441_v8  ;;  %955 = vmatpush1.bf16.msra.mxu1 %v1462_v19  ;;  %v1480_v57 = vld [vmem:[%s2047_s3 + $0xbc] ss:$28 sps:$4 sm:$0xff]   ;;  %v1485_v61 = vld [vmem:[%s2047_s3 + $0xf4] ss:$28 sps:$4 sm:$0xff]   ;;  %v1490_v1 = vld [vmem:[%s2047_s3 + $0x12c] ss:$28 sps:$4 sm:$0xff]  }
  0x50   :  { %993 = vmatprep.subr.bf16.mxu0 %v1449_v9  ;;  %1010 = vmatprep.subr.bf16.mxu1 %v1465_v20  ;;  %v1481_v58 = vld [vmem:[%s2047_s3 + $0x280] ss:$28 sps:$4 sm:$0xff]   ;;  %v1478_v59 = vld [vmem:[%s2047_s3 + $0xb8] ss:$28 sps:$4 sm:$0xff]   ;;  %v1483_v63 = vld [vmem:[%s2047_s3 + $0xf0] ss:$28 sps:$4 sm:$0xff]  }
  0x51   :  { %v1482_v60 = vld [vmem:[%s2047_s3 + $0xc0] ss:$28 sps:$4 sm:$0xff]   ;;  %v1486_v62 = vld [vmem:[%s2047_s3 + $0x2b8] ss:$28 sps:$4 sm:$0xff]   ;;  %v1491_v2 = vld [vmem:[%s2047_s3 + $0x2f0] ss:$28 sps:$4 sm:$0xff]  }
  0x52   :  { %v1487_v0 = vld [vmem:[%s2047_s3 + $0xf8] ss:$28 sps:$4 sm:$0xff]   ;;  %v1488_v3 = vld [vmem:[%s2047_s3 + $0x128] ss:$28 sps:$4 sm:$0xff]   ;;  %v1492_v4 = vld [vmem:[%s2047_s3 + $0x130] ss:$28 sps:$4 sm:$0xff]  }
  0x53   :  { %994 = vmatpush1.bf16.msra.mxu0 %v1447_v10  ;;  %v1495_v5 = vld [vmem:[%s2047_s3 + $0x164] ss:$28 sps:$4 sm:$0xff]   ;;  %v1500_v9 = vld [vmem:[%s2047_s3 + $0x19c] ss:$28 sps:$4 sm:$0xff]   ;;  %v1508_v15 = vld [vmem:[%s2047_s3 + $0x20c] ss:$28 sps:$4 sm:$0xff]  }
  0x54   :  { %995 = vmatprep.subr.bf16.mxu0 %v1455_v13  ;;  %v1496_v6 = vld [vmem:[%s2047_s3 + $0x328] ss:$28 sps:$4 sm:$0xff]   ;;  %v1493_v7 = vld [vmem:[%s2047_s3 + $0x160] ss:$28 sps:$4 sm:$0xff]   ;;  %v1498_v11 = vld [vmem:[%s2047_s3 + $0x198] ss:$28 sps:$4 sm:$0xff]  }
  0x55   :  { %v1497_v8 = vld [vmem:[%s2047_s3 + $0x168] ss:$28 sps:$4 sm:$0xff]   ;;  %v1501_v10 = vld [vmem:[%s2047_s3 + $0x360] ss:$28 sps:$4 sm:$0xff]   ;;  %v1505_v13 = vld [vmem:[%s2047_s3 + $0x1d4] ss:$28 sps:$4 sm:$0xff]  }
  0x56   :  { %v1502_v12 = vld [vmem:[%s2047_s3 + $0x1a0] ss:$28 sps:$4 sm:$0xff]   ;;  %v1506_v16 = vld [vmem:[%s2047_s3 + $0x208] ss:$28 sps:$4 sm:$0xff]   ;;  %v1512_v20 = vld [vmem:[%s2047_s3 + $0x278] ss:$28 sps:$4 sm:$0xff]  }
  0x57   :  { %996 = vmatpush1.bf16.msra.mxu0 %v1453_v14  ;;  %v1503_v14 = vld [vmem:[%s2047_s3 + $0x1d0] ss:$28 sps:$4 sm:$0xff]   ;;  %v1514_v19 = vld [vmem:[%s2047_s3 + $0x27c] ss:$28 sps:$4 sm:$0xff]  }
  0x58   :  { %997 = vmatprep.subr.bf16.mxu0 %v1461_v17  ;;  %v1511_v17 = vld [vmem:[%s2047_s3 + $0x244] ss:$28 sps:$4 sm:$0xff]   ;;  %v1515_v22 = vld [vmem:[%s2047_s3 + $0x2b0] ss:$28 sps:$4 sm:$0xff]  }
  0x59   :  { %v1520_v25 = vld [vmem:[%s2047_s3 + $0x2ec] ss:$28 sps:$4 sm:$0xff]  }
  0x5b   :  { %998 = vmatpush1.bf16.msra.mxu0 %v1459_v18  ;;  %v1509_v18 = vld [vmem:[%s2047_s3 + $0x240] ss:$28 sps:$4 sm:$0xff]  }
  0x5c   :  { %1321 = vmatprep.subr.bf16.mxu0 %v1466_v21  ;;  %v1517_v21 = vld [vmem:[%s2047_s3 + $0x2b4] ss:$28 sps:$4 sm:$0xff]  }
  0xf1   :  { %v160_v29 = vpop.f32.mrb[0].mxu0 }
  0xf2   :  { %v161_v30 = vadd.f32 %v160_v29, %v43_v27  ;;  %v162_v31 = vpop.f32.mrb[1].mxu0  ;;  %v1521_v29 = vld [vmem:[%s2047_s3 + $0x320] ss:$28 sps:$4 sm:$0xff]  }
  0xf3   :  { %v163_v32 = vadd.f32 %v162_v31, %v47_v28  ;;  %v164_v33 = vpop.f32.mrb[2].mxu0  ;;  %v1524_v31 = vld [vmem:[%s2047_s3 + $0x358] ss:$28 sps:$4 sm:$0xff]  }
  0xf4   :  { %v173_v34 = vmul.f32 0.2, %v161_v30  ;;  %v165_v35 = vadd.f32 %v164_v33, %v43_v27  ;;  %v166_v36 = vpop.f32.mrb[3].mxu0  ;;  %vm169_vm2 = vcmp.gt.f32.partialorder %v161_v30, 0.0  ;;  %v1518_v27 = vld [vmem:[%s2047_s3 + $0x2e8] ss:$28 sps:$4 sm:$0xff]  }
  0xf5   :  { %v174_v37 = vmul.f32 0.2, %v163_v32  ;;  %v167_v38 = vadd.f32 %v166_v36, %v47_v28  ;;  %vm170_vm3 = vcmp.gt.f32.partialorder %v163_v32, 0.0  ;;  %v1523_v28 = vld [vmem:[%s2047_s3 + $0x324] ss:$28 sps:$4 sm:$0xff]  }
  0xf6   :  { %vm171_vm4 = vcmp.gt.f32.partialorder %v165_v35, 0.0  ;;  %v175_v39 = vmul.f32 0.2, %v165_v35  ;;  %v177_v41 = vsel %vm169_vm2, %v161_v30, %v173_v34  ;;  %v1526_v30 = vld [vmem:[%s2047_s3 + $0x35c] ss:$28 sps:$4 sm:$0xff]   ;;  %v327_v34 = vsub.s32 3, %v1856_v23 }
  0xf7   :  { %vm172_vm5 = vcmp.gt.f32.partialorder %v167_v38, 0.0  ;;  %v176_v40 = vmul.f32 0.2, %v167_v38  ;;  %v178_v43 = vsel %vm170_vm3, %v163_v32, %v174_v37  ;;  %v323_v32 = vsub.s32 2, %v1856_v23  ;;  %v2015_v33 = vld [vmem:[%s2048_s4] sm:$0x7f] }
  0xf8   :  { %v179_v42 = vsel %vm171_vm4, %v165_v35, %v175_v39  ;;  %v316_v35 = vrot.slane %v2015_v33, %v42_v24  ;;  %v320_v37 = vrot.slane %v2015_v33, %v46_v26  ;;  %s1580_s3 = smov [#allocation2]  }
  0xf9   :  { %v1867_v44 = vpack.c.bf16 %v179_v42, %v177_v41  ;;  %v180_v45 = vsel %vm172_vm5, %v167_v38, %v176_v40  ;;  %v324_v36 = vrot.slane %v2015_v33, %v323_v32  ;;  %v328_v38 = vrot.slane %v2015_v33, %v327_v34  ;;  %s1166_s4 = sshll.u32 %s1580_s3, 4  ;;  %s1167_s4 = int_to_ptr.vmem [resolvable:$true] %s1166_s4 }
  0xfa   :  { %v182_v46 = vpack.c.bf16 %v180_v45, %v178_v43  ;;  %s1555_s6 = scalar_lea.vmem %s1167_s4, 896  ;;  %p1560_p1 = scmp.lt.s32.totalorder %s1167_s4, %s1167_s4 }
  0xfb   :  { %p1556_p0 = scmp.ne.s32.totalorder %s1167_s4, %s1555_s6  ;;  %p1561_p2 = scmp.lt.s32.totalorder %s1555_s6, %s1555_s6 }
  0xfc   :  { %956 = vmatprep.mubr.bf16.mxu1 %v182_v46  ;;  %999 = vmatprep.mubr.bf16.mxu0 %v182_v46 }
  0xfd   :  { %957 = vmatmul.mubr.bf16.vlgmr.msra.gmra.mrb[0].mxu1 %v1867_v44  ;;  %1000 = vmatmul.mubr.bf16.vlgmr.msra.gmra.mrb[4].mxu0 %v1867_v44  ;;  %p1562_p3 = por %p1561_p2, %p1560_p1 }
  0xfe   :  { %1011 = vmatpush1.bf16.msra.mxu1 %v1463_v47  ;;  %1322 = vmatpush3.bf16.msra.mxu0 %v1467_v48 }
  0xff   :  { %1042 = vmatprep.mubr.bf16.mxu1 %v182_v46  ;;  %1085 = vmatprep.mubr.bf16.mxu0 %v182_v46  ;;  %p1563_p4 = pnand %p1562_p3, %p1556_p0 }
 0x100   :  { %1012 = vmatprep.subr.bf16.mxu1 %v1470_v49  ;;  %1323 = vmatprep.subr.bf16.mxu0 %v1471_v50 }
 0x102   :  { %1013 = vmatpush1.bf16.msra.mxu1 %v1468_v51  ;;  %1324 = vmatpush3.bf16.msra.mxu0 %v1472_v52 }
 0x103   :  { %1014 = vmatprep.subr.bf16.mxu1 %v1475_v53  ;;  %1325 = vmatprep.subr.bf16.mxu0 %v1476_v54 }
 0x106   :  { %1015 = vmatpush1.bf16.msra.mxu1 %v1473_v55  ;;  %1326 = vmatpush3.bf16.msra.mxu0 %v1477_v56 }
 0x107   :  { %1016 = vmatprep.subr.bf16.mxu1 %v1480_v57  ;;  %1327 = vmatprep.subr.bf16.mxu0 %v1481_v58 }
 0x10a   :  { %1017 = vmatpush1.bf16.msra.mxu1 %v1478_v59  ;;  %1328 = vmatpush3.bf16.msra.mxu0 %v1482_v60 }
 0x10b   :  { %1018 = vmatprep.subr.bf16.mxu1 %v1485_v61  ;;  %1329 = vmatprep.subr.bf16.mxu0 %v1486_v62 }
 0x10e   :  { %1019 = vmatpush1.bf16.msra.mxu1 %v1483_v63  ;;  %1330 = vmatpush3.bf16.msra.mxu0 %v1487_v0 }
 0x10f   :  { %1020 = vmatprep.subr.bf16.mxu1 %v1490_v1  ;;  %1331 = vmatprep.subr.bf16.mxu0 %v1491_v2  ;;  %v339_v1 = vsub.s32 6, %v1856_v23 }
 0x112   :  { %1021 = vmatpush1.bf16.msra.mxu1 %v1488_v3  ;;  %1332 = vmatpush3.bf16.msra.mxu0 %v1492_v4  ;;  %v340_v3 = vrot.slane %v2015_v33, %v339_v1 }
 0x113   :  { %1022 = vmatprep.subr.bf16.mxu1 %v1495_v5  ;;  %1333 = vmatprep.subr.bf16.mxu0 %v1496_v6 }
 0x116   :  { %1023 = vmatpush1.bf16.msra.mxu1 %v1493_v7  ;;  %1334 = vmatpush3.bf16.msra.mxu0 %v1497_v8 }
 0x117   :  { %1024 = vmatprep.subr.bf16.mxu1 %v1500_v9  ;;  %1335 = vmatprep.subr.bf16.mxu0 %v1501_v10 }
 0x11a   :  { %1025 = vmatpush1.bf16.msra.mxu1 %v1498_v11  ;;  %1336 = vmatpush3.bf16.msra.mxu0 %v1502_v12 }
 0x11b   :  { %1026 = vmatprep.subr.bf16.mxu1 %v1505_v13 }
 0x11d   :  { %1086 = vmatmul.mubr.bf16.vlgmr.msra.gmra.mrb[8].mxu0 %v1867_v44 }
 0x11e   :  { %1027 = vmatpush1.bf16.msra.mxu1 %v1503_v14 }
 0x11f   :  { %1028 = vmatprep.subr.bf16.mxu1 %v1508_v15  ;;  %v331_v15 = vsub.s32 4, %v1856_v23 }
 0x122   :  { %1029 = vmatpush1.bf16.msra.mxu1 %v1506_v16  ;;  %v335_v16 = vsub.s32 5, %v1856_v23 }
 0x123   :  { %1030 = vmatprep.subr.bf16.mxu1 %v1511_v17  ;;  %v332_v17 = vrot.slane %v2015_v33, %v331_v15 }
 0x126   :  { %1031 = vmatpush1.bf16.msra.mxu1 %v1509_v18  ;;  %v336_v18 = vrot.slane %v2015_v33, %v335_v16 }
 0x127   :  { %1032 = vmatprep.subr.bf16.mxu1 %v1514_v19 }
 0x12a   :  { %1033 = vmatpush1.bf16.msra.mxu1 %v1512_v20 }
 0x12b   :  { %1034 = vmatprep.subr.bf16.mxu1 %v1517_v21 }
 0x12e   :  { %1035 = vmatpush1.bf16.msra.mxu1 %v1515_v22 }
 0x12f   :  { %1036 = vmatprep.subr.bf16.mxu1 %v1520_v25 }
 0x132   :  { %1037 = vmatpush1.bf16.msra.mxu1 %v1518_v27 }
 0x133   :  { %1038 = vmatprep.subr.bf16.mxu1 %v1523_v28 }
 0x136   :  { %1039 = vmatpush1.bf16.msra.mxu1 %v1521_v29 }
 0x137   :  { %1040 = vmatprep.subr.bf16.mxu1 %v1526_v30 }
 0x13a   :  { %1041 = vmatpush1.bf16.msra.mxu1 %v1524_v31 }
 0x13d   :  { %1043 = vmatmul.mubr.bf16.vlgmr.msra.gmra.mrb[4].mxu1 %v1867_v44 }
 0x1d0   :  { %v958_v39 = vpop.f32.mrb[0].mxu1  ;;  %v1001_v40 = vpop.f32.mrb[4].mxu0 }
 0x1d1   :  { %v959_v41 = vadd.f32 %v958_v39, %v316_v35  ;;  %v1002_v42 = vadd.f32 %v1001_v40, %v324_v36  ;;  %v960_v43 = vpop.f32.mrb[1].mxu1  ;;  %v1003_v44 = vpop.f32.mrb[5].mxu0 }
 0x1d2   :  { %v961_v45 = vadd.f32 %v960_v43, %v320_v37  ;;  %v1004_v46 = vadd.f32 %v1003_v44, %v328_v38  ;;  %v962_v47 = vpop.f32.mrb[2].mxu1  ;;  %v1005_v48 = vpop.f32.mrb[6].mxu0 }
 0x1d3   :  { %1527 = vtanh.f32 %v959_v41  ;;  %v963_v24 = vadd.f32 %v962_v47, %v316_v35  ;;  %v964_v49 = vpop.f32.mrb[3].mxu1  ;;  %v1007_v50 = vpop.f32.mrb[7].mxu0  ;;  %v1006_v51 = vadd.f32 %v1005_v48, %v324_v36 }
 0x1d4   :  { %1529 = vtanh.f32 %v1002_v42  ;;  %v965_v26 = vadd.f32 %v964_v49, %v320_v37  ;;  %v1008_v52 = vadd.f32 %v1007_v50, %v328_v38 }
 0x1d5   :  { %1531 = vtanh.f32 %v961_v45 }
 0x1d6   :  { %1533 = vtanh.f32 %v1004_v46 }
 0x1d7   :  { %1535 = vtanh.f32 %v963_v24 }
 0x1d8   :  { %1537 = vtanh.f32 %v1006_v51 }
 0x1d9   :  { %1539 = vtanh.f32 %v965_v26 }
 0x1da   :  { %1541 = vtanh.f32 %v1008_v52 }
 0x1dd   :  { %v1528_v53 = vpop.eup %1527 }
 0x1de   :  { %v1530_v54 = vpop.eup %1529 }
 0x1df   :  { %v1532_v55 = vpop.eup %1531 }
 0x1e0   :  { %v1534_v56 = vpop.eup %1533  ;;  %v1313_v57 = vpack.c.bf16 %v1532_v55, %v1528_v53 }
 0x1e1   :  { %v1536_v58 = vpop.eup %1535  ;;  %v1314_v59 = vpack.c.bf16 %v1534_v56, %v1530_v54 }
 0x1e2   :  { %v1538_v60 = vpop.eup %1537  ;;  %1152 = vst [vmem:[#allocation2] sm:$0xff] %v1313_v57 }
 0x1e3   :  { %v1540_v61 = vpop.eup %1539  ;;  %1153 = vst [vmem:[#allocation2 + $0x8] sm:$0xff] %v1314_v59 }
 0x1e4   :  { %v1542_v62 = vpop.eup %1541  ;;  %v1317_v63 = vpack.c.bf16 %v1540_v61, %v1536_v58 }
 0x1e5   :  { %v1318_v0 = vpack.c.bf16 %v1542_v62, %v1538_v60 }
 0x1e6   :  { %1157 = vst [vmem:[#allocation2 + $0x1c] sm:$0xff] %v1317_v63 }
 0x1e7   :  { %1158 = vst [vmem:[#allocation2 + $0x24] sm:$0xff] %v1318_v0 }
 0x1f0   :  { %v1337_v2 = vpop.f32.mrb[8].mxu0 }
 0x1f1   :  { %v1338_v4 = vpop.f32.mrb[9].mxu0 }
 0x1f2   :  { %v1339_v5 = vadd.f32 %v1338_v4, %v1337_v2  ;;  %v1340_v6 = vpop.f32.mrb[10].mxu0 }
 0x1f3   :  { %v1341_v7 = vpop.f32.mrb[11].mxu0 }
 0x1f4   :  { %v1088_v8 = vadd.f32 %v1339_v5, %v340_v3  ;;  %v1342_v9 = vadd.f32 %v1341_v7, %v1340_v6 }
 0x1f6   :  { %1543 = vtanh.f32 %v1088_v8  ;;  %v1091_v10 = vadd.f32 %v1342_v9, %v340_v3 }
 0x1f8   :  { %1545 = vtanh.f32 %v1091_v10 }
 0x200   :  { %v1544_v11 = vpop.eup %1543 }
 0x201   :  { %v1316_v12 = vpack.c.bf16 %v1544_v11, %v1544_v11 }
 0x202   :  { %v1546_v13 = vpop.eup %1545 }
 0x203   :  { %1156 = vst.msk [vmem:[#allocation2 + $0x18] sm:$0xf] %vm1155_vm6, %v1316_v12  ;;  %v1320_v14 = vpack.c.bf16 %v1546_v13, %v1546_v13 }
 0x205   :  { %1160 = vst.msk [vmem:[#allocation2 + $0x34] sm:$0xf] %vm1155_vm6, %v1320_v14 }
 0x210   :  { %v1044_v19 = vpop.f32.mrb[4].mxu1 }
 0x211   :  { %v1045_v20 = vadd.f32 %v1044_v19, %v332_v17  ;;  %v1046_v21 = vpop.f32.mrb[5].mxu1 }
 0x212   :  { %v1047_v22 = vadd.f32 %v1046_v21, %v336_v18  ;;  %v1048_v25 = vpop.f32.mrb[6].mxu1 }
 0x213   :  { %1547 = vtanh.f32 %v1045_v20  ;;  %v1049_v27 = vadd.f32 %v1048_v25, %v332_v17  ;;  %v1050_v28 = vpop.f32.mrb[7].mxu1 }
 0x214   :  { %1549 = vtanh.f32 %v1047_v22  ;;  %v1051_v29 = vadd.f32 %v1050_v28, %v336_v18 }
 0x215   :  { %1551 = vtanh.f32 %v1049_v27 }
 0x216   :  { %1553 = vtanh.f32 %v1051_v29 }
 0x21d   :  { %v1548_v30 = vpop.eup %1547 }
 0x21e   :  { %v1550_v31 = vpop.eup %1549 }
 0x21f   :  { %v1552_v23 = vpop.eup %1551  ;;  %v1315_v32 = vpack.c.bf16 %v1550_v31, %v1548_v30 }
 0x220   :  { %v1554_v34 = vpop.eup %1553 }
 0x221   :  { %1154 = vst [vmem:[#allocation2 + $0x10] sm:$0xff] %v1315_v32  ;;  %v1319_v33 = vpack.c.bf16 %v1554_v34, %v1552_v23 }
 0x223   :  { %1159 = vst [vmem:[#allocation2 + $0x2c] sm:$0xff] %v1319_v33 }
 0x224   :  { %1566 = shalt.err (!%p1563_p4)
}
 0x225   :  { %s1567_s9 = scalar_lea.hbm %s2049_s5, 896 }
 0x226   :  { %p1568_p5 = scmp.ne.s32.totalorder %s2049_s5, %s1567_s9  ;;  %p1571_p6 = scmp.lt.u32.totalorder %s1567_s9, %s2049_s5 }
 0x228   :  { %p1573_p7 = pnand %p1571_p6, %p1568_p5 }
 0x22a   :  { %1576 = shalt.err (!%p1573_p7)
}
 0x22b   :  { %s1581_s1 = smov 448   ;;  %s1582_s14 = smov 28  }
 0x22c   :  { %1172 = dma.vmem_to_hbm [thread:$0]  %s1167_s4, 896, %s2049_s5, [#allocation3], %s1581_s1, %s1581_s1, %s1582_s14  }
 0x22d   :  { %1577 = dma.done.wait [#allocation3], 896  }
 0x22e   :  { %1578 = vsyncadd [#allocation3], 4294966400 }
 0x22f   :  { %1176 = vsyncpa [#allocation3], 1 }

</bundles_post_ra>
